<compile_context>
chip_gen: v7x
topology: tpu7x:2x2x1
jax: 0.10.0
libtpu: 0.0.40
codegen_flags: <defaults>
</compile_context>

<pallas_src>
import functools

import jax
import jax.numpy as jnp
from jax.experimental import pallas as pl
from jax.experimental.pallas import tpu as pltpu


def _round_up(x: int, m: int) -> int:
    return ((x + m - 1) // m) * m


def _edge_update_kernel(src_ref, dst_ref, ea_ref, ee_ref,
                        w1a_ref, w1b_ref, w1c_ref, w1d_ref, b1_ref,
                        w2_ref, b2_ref, out_ref):
    # src/dst/ea/ee refs: (tm, H) in the caller dtype (cast to bf16 here)
    # w1{a..d}: (H, Hp) bf16 (row-blocks of fc1 weight), b1: (1, Hp) f32
    # w2: (Hp, Hp) bf16, b2: (1, Hp) f32
    # out: (tm, Hp) bf16, lane-dense
    bf16 = jnp.bfloat16
    f32 = jnp.float32
    # fc1 as a K-split accumulation over the four concatenated feature blocks.
    h = jnp.dot(src_ref[...].astype(bf16), w1a_ref[...], preferred_element_type=f32)
    h = h + jnp.dot(dst_ref[...].astype(bf16), w1b_ref[...], preferred_element_type=f32)
    h = h + jnp.dot(ea_ref[...].astype(bf16), w1c_ref[...], preferred_element_type=f32)
    h = h + jnp.dot(ee_ref[...].astype(bf16), w1d_ref[...], preferred_element_type=f32)
    h = jnp.maximum(h + b1_ref[...], 0.0)                       # f32 bias + ReLU
    o = jnp.dot(h.astype(bf16), w2_ref[...], preferred_element_type=f32) + b2_ref[...]
    out_ref[...] = jnp.maximum(o, 0.0).astype(out_ref.dtype)    # bf16 lane-dense store


def _pick_row_tile(E, H, Hp, tm_max, in_bytes):
    """Row tile: as big as a v7x-safe VMEM budget allows, >=2 grid steps."""
    def footprint(t):
        inputs = 4 * 2 * t * H * in_bytes          # 4 streams, double-buffered
        out = 2 * t * Hp * 2                       # bf16 output, double-buffered
        weights = 2 * (4 * H * Hp + Hp * Hp) * 2   # bf16 weights (x2 slack)
        biases = 2 * 2 * Hp * 4
        interm = 2 * t * Hp * 4                    # f32 h / o temporaries
        return inputs + out + weights + biases + interm

    t = max(16, min(_round_up(tm_max, 16), _round_up(E, 16)))   # bf16 sublane granule
    budget = 32 * 1024 * 1024                                   # v7x: 64 MiB VMEM / TC
    while footprint(t) > budget and t > 16:
        t = max(16, _round_up(t // 2, 16))
    # Ensure >= 2 grid steps so the "parallel" edge axis splits across v7x's 2 TCs.
    while pl.cdiv(E, t) < 2 and t > 16:
        t = max(16, _round_up(t // 2, 16))
    return t, footprint(t)


@functools.partial(jax.jit, static_argnames=("tm",))
def edge_update(src, dest, edge_attr, encoded_edge, params, *, tm=1024):
    """Pallas EdgeUpdate forward. (`batch` of the torch module is unused.)"""
    w1, b1, w2, b2 = params["w1"], params["b1"], params["w2"], params["b2"]
    E, H = src.shape
    Hp = _round_up(H, 128)                      # lane-dense output width
    in_bytes = jnp.dtype(src.dtype).itemsize

    tm_eff, footprint = _pick_row_tile(E, H, Hp, tm, in_bytes)
    grid = (pl.cdiv(E, tm_eff),)

    # --- tiny one-time weight prep (split fc1 rows, pad out-dim, cast bf16) ---
    def pad_w1_block(i):
        return jnp.pad(w1[i * H:(i + 1) * H], ((0, 0), (0, Hp - H))).astype(jnp.bfloat16)

    w1a, w1b, w1c, w1d = (pad_w1_block(i) for i in range(4))
    w2p = jnp.pad(w2, ((0, Hp - H), (0, Hp - H))).astype(jnp.bfloat16)
    b1p = jnp.pad(b1, ((0, 0), (0, Hp - H))).astype(jnp.float32)
    b2p = jnp.pad(b2, ((0, 0), (0, Hp - H))).astype(jnp.float32)

    row_spec = pl.BlockSpec((tm_eff, H), lambda i: (i, 0))
    full = lambda shape: pl.BlockSpec(shape, lambda i: (0,) * len(shape))

    cost = pl.CostEstimate(
        flops=2 * E * (4 * H * Hp + Hp * Hp),
        transcendentals=0,
        bytes_accessed=(4 * E * H * in_bytes           # feature reads (single pass)
                        + E * Hp * 2                   # bf16 output writes
                        + (4 * H * Hp + Hp * Hp) * 2   # bf16 weights
                        + 2 * Hp * 4),                 # f32 biases
    )

    out = pl.pallas_call(
        _edge_update_kernel,
        out_shape=jax.ShapeDtypeStruct((E, Hp), jnp.bfloat16),
        grid_spec=pltpu.PrefetchScalarGridSpec(
            num_scalar_prefetch=0,
            grid=grid,
            in_specs=[
                row_spec, row_spec, row_spec, row_spec,          # src/dest/edge_attr/enc
                full(w1a.shape), full(w1b.shape),                # fc1 row-blocks
                full(w1c.shape), full(w1d.shape),
                full(b1p.shape),
                full(w2p.shape), full(b2p.shape),                # fc2
            ],
            out_specs=pl.BlockSpec((tm_eff, Hp), lambda i: (i, 0)),
        ),
        compiler_params=pltpu.CompilerParams(
            dimension_semantics=("parallel",),
            vmem_limit_bytes=int(min(64 * 1024 * 1024,
                                     max(16 * 1024 * 1024, 2 * footprint))),
        ),
        cost_estimate=cost,
    )(src, dest, edge_attr, encoded_edge, w1a, w1b, w1c, w1d, b1p, w2p, b2p)

    # TODO(synk): drop this slice/cast when the consumer accepts the padded bf16 slab.
    return out[:, :H].astype(src.dtype)


def init_params(key, mlp_size):
    """Deterministic torch.nn.Linear-style init (uniform(-1/sqrt(fan_in), ...))."""
    k1, k2, k3, k4 = jax.random.split(key, 4)
    in1 = 4 * mlp_size
    lim1 = 1.0 / jnp.sqrt(in1)
    lim2 = 1.0 / jnp.sqrt(mlp_size)
    return {
        # stored as (in, out) so the kernel does x @ W (== torch x @ W.T)
        "w1": jax.random.uniform(k1, (in1, mlp_size), jnp.float32, -lim1, lim1),
        "b1": jax.random.uniform(k2, (1, mlp_size), jnp.float32, -lim1, lim1),
        "w2": jax.random.uniform(k3, (mlp_size, mlp_size), jnp.float32, -lim2, lim2),
        "b2": jax.random.uniform(k4, (1, mlp_size), jnp.float32, -lim2, lim2),
    }


def edge_update_ref(src, dest, edge_attr, encoded_edge, params):
    # Reference using the same precision policy as the kernel:
    # bf16 matmul operands, f32 accumulation, f32 bias/ReLU, bf16 output rounding.
    bf16 = jnp.bfloat16
    x = jnp.concatenate([src, dest, edge_attr, encoded_edge], axis=1).astype(bf16)
    w1 = params["w1"].astype(bf16)
    w2 = params["w2"].astype(bf16)
    h = jnp.maximum(
        jnp.dot(x, w1, preferred_element_type=jnp.float32) + params["b1"], 0.0)
    o = jnp.dot(h.astype(bf16), w2,
                preferred_element_type=jnp.float32) + params["b2"]
    o = jnp.maximum(o, 0.0)
    return o.astype(bf16).astype(jnp.float32)


if __name__ == "__main__":
    mlp_size = 32          # H
    num_edges = 64         # E
    key = jax.random.PRNGKey(0)
    kp, ks, kd, ke, kn = jax.random.split(key, 5)

    params = init_params(kp, mlp_size)
    src = jax.random.normal(ks, (num_edges, mlp_size), jnp.float32)
    dest = jax.random.normal(kd, (num_edges, mlp_size), jnp.float32)
    edge_attr = jax.random.normal(ke, (num_edges, mlp_size), jnp.float32)
    encoded_edge = jax.random.normal(kn, (num_edges, mlp_size), jnp.float32)
    # `batch` (graph-id per edge) is accepted but unused by the torch forward.
    batch = jnp.zeros((num_edges,), jnp.int32)  # noqa: F841

    out = edge_update(src, dest, edge_attr, encoded_edge, params)
    jax.block_until_ready(out)

    ref = edge_update_ref(src, dest, edge_attr, encoded_edge, params)
    assert out.shape == (num_edges, mlp_size)
    assert out.dtype == src.dtype
    max_err = float(jnp.max(jnp.abs(out - ref)))
    assert jnp.allclose(out, ref, atol=2e-2, rtol=2e-2), max_err
    print("KERNEL_OK")
</pallas_src>

<mosaic_0001>
module attributes {stable_mosaic.version = 11 : i64} {
  func.func @_edge_update_kernel(%arg0: i32, %arg1: memref<32x32xf32, #tpu.memory_space<vmem>>, %arg2: memref<32x32xf32, #tpu.memory_space<vmem>>, %arg3: memref<32x32xf32, #tpu.memory_space<vmem>>, %arg4: memref<32x32xf32, #tpu.memory_space<vmem>>, %arg5: memref<32x128xbf16, #tpu.memory_space<vmem>>, %arg6: memref<32x128xbf16, #tpu.memory_space<vmem>>, %arg7: memref<32x128xbf16, #tpu.memory_space<vmem>>, %arg8: memref<32x128xbf16, #tpu.memory_space<vmem>>, %arg9: memref<1x128xf32, #tpu.memory_space<vmem>>, %arg10: memref<128x128xbf16, #tpu.memory_space<vmem>>, %arg11: memref<1x128xf32, #tpu.memory_space<vmem>>, %arg12: memref<32x128xbf16, #tpu.memory_space<vmem>>) attributes {dimension_semantics = [#tpu.dimension_semantics<parallel>], iteration_bounds = array<i64: 2>, scalar_prefetch = 0 : i64, scratch_operands = 0 : i64, tpu.core_type = #tpu.core_type<tc>, window_params = [{transform_indices = @transform_0, window_bounds = array<i64: 32, 32>}, {transform_indices = @transform_1, window_bounds = array<i64: 32, 32>}, {transform_indices = @transform_2, window_bounds = array<i64: 32, 32>}, {transform_indices = @transform_3, window_bounds = array<i64: 32, 32>}, {pipeline_mode = #tpu.pipeline_mode<synchronous>, transform_indices = @transform_4, window_bounds = array<i64: 32, 128>}, {pipeline_mode = #tpu.pipeline_mode<synchronous>, transform_indices = @transform_5, window_bounds = array<i64: 32, 128>}, {pipeline_mode = #tpu.pipeline_mode<synchronous>, transform_indices = @transform_6, window_bounds = array<i64: 32, 128>}, {pipeline_mode = #tpu.pipeline_mode<synchronous>, transform_indices = @transform_7, window_bounds = array<i64: 32, 128>}, {pipeline_mode = #tpu.pipeline_mode<synchronous>, transform_indices = @transform_8, window_bounds = array<i64: 1, 128>}, {pipeline_mode = #tpu.pipeline_mode<synchronous>, transform_indices = @transform_9, window_bounds = array<i64: 128, 128>}, {pipeline_mode = #tpu.pipeline_mode<synchronous>, transform_indices = @transform_10, window_bounds = array<i64: 1, 128>}, {transform_indices = @transform_11, window_bounds = array<i64: 32, 128>}]} {
    %c0 = arith.constant 0 : index
    %c0_0 = arith.constant 0 : index
    %0 = vector.load %arg1[%c0, %c0_0] : memref<32x32xf32, #tpu.memory_space<vmem>>, vector<32x32xf32>
    %1 = arith.truncf %0 : vector<32x32xf32> to vector<32x32xbf16>
    %c0_1 = arith.constant 0 : index
    %c0_2 = arith.constant 0 : index
    %2 = vector.load %arg5[%c0_1, %c0_2] : memref<32x128xbf16, #tpu.memory_space<vmem>>, vector<32x128xbf16>
    %cst = arith.constant dense<0.000000e+00> : vector<32x128xf32>
    %3 = tpu.matmul %1, %2, %cst {dimension_numbers = #tpu.dot_dimension_numbers<[1], [0], [0], [1], [0, 0, 1, 1], [], []>} : vector<32x32xbf16>, vector<32x128xbf16>, vector<32x128xf32> -> vector<32x128xf32>
    %c0_3 = arith.constant 0 : index
    %c0_4 = arith.constant 0 : index
    %4 = vector.load %arg2[%c0_3, %c0_4] : memref<32x32xf32, #tpu.memory_space<vmem>>, vector<32x32xf32>
    %5 = arith.truncf %4 : vector<32x32xf32> to vector<32x32xbf16>
    %c0_5 = arith.constant 0 : index
    %c0_6 = arith.constant 0 : index
    %6 = vector.load %arg6[%c0_5, %c0_6] : memref<32x128xbf16, #tpu.memory_space<vmem>>, vector<32x128xbf16>
    %cst_7 = arith.constant dense<0.000000e+00> : vector<32x128xf32>
    %7 = tpu.matmul %5, %6, %cst_7 {dimension_numbers = #tpu.dot_dimension_numbers<[1], [0], [0], [1], [0, 0, 1, 1], [], []>} : vector<32x32xbf16>, vector<32x128xbf16>, vector<32x128xf32> -> vector<32x128xf32>
    %8 = arith.addf %3, %7 : vector<32x128xf32>
    %c0_8 = arith.constant 0 : index
    %c0_9 = arith.constant 0 : index
    %9 = vector.load %arg3[%c0_8, %c0_9] : memref<32x32xf32, #tpu.memory_space<vmem>>, vector<32x32xf32>
    %10 = arith.truncf %9 : vector<32x32xf32> to vector<32x32xbf16>
    %c0_10 = arith.constant 0 : index
    %c0_11 = arith.constant 0 : index
    %11 = vector.load %arg7[%c0_10, %c0_11] : memref<32x128xbf16, #tpu.memory_space<vmem>>, vector<32x128xbf16>
    %cst_12 = arith.constant dense<0.000000e+00> : vector<32x128xf32>
    %12 = tpu.matmul %10, %11, %cst_12 {dimension_numbers = #tpu.dot_dimension_numbers<[1], [0], [0], [1], [0, 0, 1, 1], [], []>} : vector<32x32xbf16>, vector<32x128xbf16>, vector<32x128xf32> -> vector<32x128xf32>
    %13 = arith.addf %8, %12 : vector<32x128xf32>
    %c0_13 = arith.constant 0 : index
    %c0_14 = arith.constant 0 : index
    %14 = vector.load %arg4[%c0_13, %c0_14] : memref<32x32xf32, #tpu.memory_space<vmem>>, vector<32x32xf32>
    %15 = arith.truncf %14 : vector<32x32xf32> to vector<32x32xbf16>
    %c0_15 = arith.constant 0 : index
    %c0_16 = arith.constant 0 : index
    %16 = vector.load %arg8[%c0_15, %c0_16] : memref<32x128xbf16, #tpu.memory_space<vmem>>, vector<32x128xbf16>
    %cst_17 = arith.constant dense<0.000000e+00> : vector<32x128xf32>
    %17 = tpu.matmul %15, %16, %cst_17 {dimension_numbers = #tpu.dot_dimension_numbers<[1], [0], [0], [1], [0, 0, 1, 1], [], []>} : vector<32x32xbf16>, vector<32x128xbf16>, vector<32x128xf32> -> vector<32x128xf32>
    %18 = arith.addf %13, %17 : vector<32x128xf32>
    %c0_18 = arith.constant 0 : index
    %c0_19 = arith.constant 0 : index
    %19 = vector.load %arg9[%c0_18, %c0_19] : memref<1x128xf32, #tpu.memory_space<vmem>>, vector<1x128xf32>
    %20 = vector.broadcast %19 : vector<1x128xf32> to vector<32x128xf32>
    %21 = arith.addf %18, %20 : vector<32x128xf32>
    %cst_20 = arith.constant 0.000000e+00 : f32
    %22 = vector.broadcast %cst_20 : f32 to vector<32x128xf32>
    %23 = arith.maximumf %21, %22 : vector<32x128xf32>
    %24 = arith.truncf %23 : vector<32x128xf32> to vector<32x128xbf16>
    %c0_21 = arith.constant 0 : index
    %c0_22 = arith.constant 0 : index
    %25 = vector.load %arg10[%c0_21, %c0_22] : memref<128x128xbf16, #tpu.memory_space<vmem>>, vector<128x128xbf16>
    %cst_23 = arith.constant dense<0.000000e+00> : vector<32x128xf32>
    %26 = tpu.matmul %24, %25, %cst_23 {dimension_numbers = #tpu.dot_dimension_numbers<[1], [0], [0], [1], [0, 0, 1, 1], [], []>} : vector<32x128xbf16>, vector<128x128xbf16>, vector<32x128xf32> -> vector<32x128xf32>
    %c0_24 = arith.constant 0 : index
    %c0_25 = arith.constant 0 : index
    %27 = vector.load %arg11[%c0_24, %c0_25] : memref<1x128xf32, #tpu.memory_space<vmem>>, vector<1x128xf32>
    %28 = vector.broadcast %27 : vector<1x128xf32> to vector<32x128xf32>
    %29 = arith.addf %26, %28 : vector<32x128xf32>
    %cst_26 = arith.constant 0.000000e+00 : f32
    %30 = vector.broadcast %cst_26 : f32 to vector<32x128xf32>
    %31 = arith.maximumf %29, %30 : vector<32x128xf32>
    %32 = arith.truncf %31 : vector<32x128xf32> to vector<32x128xbf16>
    %c0_27 = arith.constant 0 : index
    %c0_28 = arith.constant 0 : index
    %33 = vector.load %arg12[%c0_27, %c0_28] : memref<32x128xbf16, #tpu.memory_space<vmem>>, vector<32x128xbf16>
    tpu.vector_store %arg12[%c0_27, %c0_28], %32 {strides = array<i32>} : memref<32x128xbf16, #tpu.memory_space<vmem>>, vector<32x128xbf16>,
    return
  }
  func.func @transform_0(%arg0: i32) -> (i32, i32) {
    %c0_i32 = arith.constant 0 : i32
    %c0_i32_0 = arith.constant 0 : i32
    return %arg0, %c0_i32 : i32, i32
  }
  func.func @transform_1(%arg0: i32) -> (i32, i32) {
    %c0_i32 = arith.constant 0 : i32
    %c0_i32_0 = arith.constant 0 : i32
    return %arg0, %c0_i32 : i32, i32
  }
  func.func @transform_2(%arg0: i32) -> (i32, i32) {
    %c0_i32 = arith.constant 0 : i32
    %c0_i32_0 = arith.constant 0 : i32
    return %arg0, %c0_i32 : i32, i32
  }
  func.func @transform_3(%arg0: i32) -> (i32, i32) {
    %c0_i32 = arith.constant 0 : i32
    %c0_i32_0 = arith.constant 0 : i32
    return %arg0, %c0_i32 : i32, i32
  }
  func.func @transform_4(%arg0: i32) -> (i32, i32) {
    %c0_i32 = arith.constant 0 : i32
    %c0_i32_0 = arith.constant 0 : i32
    %c0_i32_1 = arith.constant 0 : i32
    return %c0_i32, %c0_i32_0 : i32, i32
  }
  func.func @transform_5(%arg0: i32) -> (i32, i32) {
    %c0_i32 = arith.constant 0 : i32
    %c0_i32_0 = arith.constant 0 : i32
    %c0_i32_1 = arith.constant 0 : i32
    return %c0_i32, %c0_i32_0 : i32, i32
  }
  func.func @transform_6(%arg0: i32) -> (i32, i32) {
    %c0_i32 = arith.constant 0 : i32
    %c0_i32_0 = arith.constant 0 : i32
    %c0_i32_1 = arith.constant 0 : i32
    return %c0_i32, %c0_i32_0 : i32, i32
  }
  func.func @transform_7(%arg0: i32) -> (i32, i32) {
    %c0_i32 = arith.constant 0 : i32
    %c0_i32_0 = arith.constant 0 : i32
    %c0_i32_1 = arith.constant 0 : i32
    return %c0_i32, %c0_i32_0 : i32, i32
  }
  func.func @transform_8(%arg0: i32) -> (i32, i32) {
    %c0_i32 = arith.constant 0 : i32
    %c0_i32_0 = arith.constant 0 : i32
    %c0_i32_1 = arith.constant 0 : i32
    return %c0_i32, %c0_i32_0 : i32, i32
  }
  func.func @transform_9(%arg0: i32) -> (i32, i32) {
    %c0_i32 = arith.constant 0 : i32
    %c0_i32_0 = arith.constant 0 : i32
    %c0_i32_1 = arith.constant 0 : i32
    return %c0_i32, %c0_i32_0 : i32, i32
  }
  func.func @transform_10(%arg0: i32) -> (i32, i32) {
    %c0_i32 = arith.constant 0 : i32
    %c0_i32_0 = arith.constant 0 : i32
    %c0_i32_1 = arith.constant 0 : i32
    return %c0_i32, %c0_i32_0 : i32, i32
  }
  func.func @transform_11(%arg0: i32) -> (i32, i32) {
    %c0_i32 = arith.constant 0 : i32
    %c0_i32_0 = arith.constant 0 : i32
    return %arg0, %c0_i32 : i32, i32
  }
}

</mosaic_0001>

<bundles_post_ra>
// kernel: edge_update.1
= control target key start
LH: loop header
LB: loop body
LE: loop exit
PB: predicated region body
PF: predicated region fallthrough
CT: control target
= control target key end

     0   :  { %s1271_s17 = smov 0   ;;  %s1369_s0 = inlined_call_operand.vmem [shape: f32[64,32], index: 0, kind: input, shape index: {}]   ;;  %s1370_s1 = inlined_call_operand.vmem [shape: f32[64,32], index: 1, kind: input, shape index: {}]   ;;  %s1371_s2 = inlined_call_operand.vmem [shape: f32[64,32], index: 2, kind: input, shape index: {}]   ;;  %s1372_s3 = inlined_call_operand.vmem [shape: f32[64,32], index: 3, kind: input, shape index: {}]   ;;  %s1373_s4 = inlined_call_operand.vmem [shape: bf16[32,128], index: 4, kind: input, shape index: {}]   ;;  %s1374_s5 = inlined_call_operand.vmem [shape: bf16[32,128], index: 5, kind: input, shape index: {}]   ;;  %s1375_s6 = inlined_call_operand.vmem [shape: bf16[32,128], index: 6, kind: input, shape index: {}]   ;;  %s1376_s7 = inlined_call_operand.vmem [shape: bf16[32,128], index: 7, kind: input, shape index: {}]   ;;  %s1377_s8 = inlined_call_operand.vmem [shape: f32[1,128], index: 8, kind: input, shape index: {}]   ;;  %s1378_s9 = inlined_call_operand.vmem [shape: bf16[128,128], index: 9, kind: input, shape index: {}]   ;;  %s1379_s10 = inlined_call_operand.vmem [shape: f32[1,128], index: 10, kind: input, shape index: {}]   ;;  %s1380_s11 = inlined_call_operand.vmem [shape: bf16[64,128], index: 11, kind: output, shape index: {}]  }
   0x1 LB: > { %s1027_s18 = sadd.s32 4294967295, %s1209_s17   ;;  %p1031_p0 = scmp.ge.s32.totalorder %s1209_s17, 1  ;;  %s1209_s17 = sphi %s1271_s17, %s21_s17  }
   0x2   : > { %p371_p1 = scmp.lt.s32.totalorder %s1209_s17, 3 }
   0x4   : > { %p372_p2 = pnand %p1031_p0, %p371_p1 }
   0x5   : > { %v1187_v0 = vld [vmem:[%s1374_s5] sm:$0xff] (!%p372_p2)   ;;  %s1032_s21 = sshll.u32 (!%p372_p2), %s1027_s18, 2  ;;  %v1188_v1 = vld [vmem:[%s1374_s5 + $0x8] sm:$0xff] (!%p372_p2)   ;;  %vm489_vm0 = vcmask (!%p372_p2), 261120   ;;  %v1197_v20 = vld [vmem:[%s1378_s9 + $0x10] sm:$0xff] (!%p372_p2)  }
   0x6   : > { %375 = sbr.rel (%p372_p2) target bundleno = 500 (0x1f4), region = 64  ;;  %p427_p3 = scmp.lt.s32.totalorder (!%p372_p2), %s1032_s21, 7  ;;  %1115 = vmatprep.subr.bf16.mxu0 (!%p372_p2), %v1187_v0  ;;  %v1189_v2 = vld [vmem:[%s1373_s4] sm:$0xff] (!%p372_p2)   ;;  %v1190_v11 = vld [vmem:[%s1373_s4 + $0x8] sm:$0xff] (!%p372_p2)   ;;  %v1198_v24 = vld [vmem:[%s1378_s9 + $0x18] sm:$0xff] (!%p372_p2)  }
   0x7   : > { %1116 = vmatpush3.bf16.msra.mxu0 (!%p372_p2), %v1187_v0  ;;  %v1191_v13 = vld [vmem:[%s1375_s6] sm:$0xff] (!%p372_p2)   ;;  %v1196_v17 = vld [vmem:[%s1378_s9 + $0x8] sm:$0xff] (!%p372_p2)   ;;  %v1201_v38 = vld [vmem:[%s1378_s9 + $0x30] sm:$0xff] (!%p372_p2)  }
   0x8   : > { %1117 = vmatprep.subr.bf16.mxu0 (!%p372_p2), %v1188_v1  ;;  %v1195_v16 = vld [vmem:[%s1378_s9] sm:$0xff] (!%p372_p2)   ;;  %v1192_v23 = vld [vmem:[%s1375_s6 + $0x8] sm:$0xff] (!%p372_p2)   ;;  %v1202_v39 = vld [vmem:[%s1378_s9 + $0x38] sm:$0xff] (!%p372_p2)  }
   0x9   : > { %1147 = vmatprep.subr.bf16.mxu1 (!%p372_p2), %v1195_v16  ;;  %v1193_v25 = vld [vmem:[%s1376_s7] sm:$0xff] (!%p372_p2)   ;;  %v1200_v31 = vld [vmem:[%s1378_s9 + $0x28] sm:$0xff] (!%p372_p2)  }
   0xa   : > { %1148 = vmatpush3.bf16.msra.mxu1 (!%p372_p2), %v1195_v16  ;;  %v1199_v26 = vld [vmem:[%s1378_s9 + $0x20] sm:$0xff] (!%p372_p2)   ;;  %v1194_v34 = vld [vmem:[%s1376_s7 + $0x8] sm:$0xff] (!%p372_p2)  }
   0xb   : > { %1118 = vmatpush3.bf16.msra.mxu0 (!%p372_p2), %v1188_v1  ;;  %1149 = vmatprep.subr.bf16.mxu1 (!%p372_p2), %v1196_v17  ;;  %v1058_v40 = vld [vmem:[%s1377_s8] ss:$0 sm:$0xff] (!%p372_p2) }
   0xc   : > { %1123 = vmatprep.subr.bf16.mxu0 (!%p372_p2), %v1189_v2  ;;  %v1059_v55 = vld [vmem:[%s1379_s10] ss:$0 sm:$0xff] (!%p372_p2) }
   0xd   : > { %s1382_s21 = smov (!%p427_p3, %s1032_s21), 7 }
   0xe   : > { %s1291_s26 = sshll.u32 %s1382_s21, 3  ;;  %1150 = vmatpush3.bf16.msra.mxu1 %v1196_v17  ;;  %s1041_s18 = sshll.u32 %s1382_s21, 2 }
   0xf   : > { %s436_s29 = scalar_lea.vmem %s1370_s1, %s1291_s26  ;;  %s430_s13 = scalar_lea.vmem %s1369_s0, %s1291_s26  ;;  %1151 = vmatprep.subr.bf16.mxu1 %v1197_v20 }
  0x10   : > { %v467_v3 = vld [vmem:[%s436_s29] sm:$0xff]  ;;  %v468_v4 = vld [vmem:[%s436_s29 + $0x8] sm:$0xff]  ;;  %v469_v5 = vld [vmem:[%s436_s29 + $0x10] sm:$0xff]  ;;  %s442_s22 = scalar_lea.vmem %s1371_s2, %s1291_s26  ;;  %s448_s20 = scalar_lea.vmem %s1372_s3, %s1291_s26 }
  0x11   : > { %v471_v6 = vpack.c.bf16 %v468_v4, %v467_v3  ;;  %v470_v7 = vld [vmem:[%s436_s29 + $0x18] sm:$0xff]  ;;  %v457_v8 = vld [vmem:[%s430_s13] sm:$0xff]  ;;  %v458_v9 = vld [vmem:[%s430_s13 + $0x8] sm:$0xff]  ;;  %s454_s23 = scalar_lea.vmem %s1380_s11, %s1041_s18 }
  0x12   : > { %v472_v10 = vpack.c.bf16 %v470_v7, %v469_v5  ;;  %v461_v12 = vpack.c.bf16 %v458_v9, %v457_v8  ;;  %v459_v14 = vld [vmem:[%s430_s13 + $0x10] sm:$0xff]  ;;  %v460_v15 = vld [vmem:[%s430_s13 + $0x18] sm:$0xff]  ;;  %v612_v18 = vld [vmem:[%s442_s22] sm:$0xff]  ;;  %1152 = vmatpush3.bf16.msra.mxu1 %v1197_v20 }
  0x13   : > { %1119 = vmatprep.mubr.msk.bf16.mxu0 %vm489_vm0, %v471_v6  ;;  %v613_v19 = vld [vmem:[%s442_s22 + $0x8] sm:$0xff]  ;;  %v462_v21 = vpack.c.bf16 %v460_v15, %v459_v14  ;;  %1153 = vmatprep.subr.bf16.mxu1 %v1198_v24  ;;  %v614_v27 = vld [vmem:[%s442_s22 + $0x10] sm:$0xff]  ;;  %v615_v28 = vld [vmem:[%s442_s22 + $0x18] sm:$0xff] }
  0x14   : > { %1120 = vmatmul.mubr.msk.bf16.vlgmr.msra.gmra.mrb[0].mxu0 %vm489_vm0, %v472_v10  ;;  %v616_v22 = vpack.c.bf16 %v613_v19, %v612_v18  ;;  %v693_v29 = vld [vmem:[%s448_s20] sm:$0xff]  ;;  %v694_v30 = vld [vmem:[%s448_s20 + $0x8] sm:$0xff]  ;;  %v617_v32 = vpack.c.bf16 %v615_v28, %v614_v27  ;;  %v695_v35 = vld [vmem:[%s448_s20 + $0x10] sm:$0xff] }
  0x15   : > { %1124 = vmatpush3.bf16.msra.mxu0 %v1189_v2  ;;  %1127 = vmatprep.mubr.msk.bf16.mxu0 %vm489_vm0, %v461_v12  ;;  %v697_v33 = vpack.c.bf16 %v694_v30, %v693_v29  ;;  %v696_v36 = vld [vmem:[%s448_s20 + $0x18] sm:$0xff] }
  0x16   : > { %1125 = vmatprep.subr.bf16.mxu0 %v1190_v11  ;;  %1154 = vmatpush3.bf16.msra.mxu1 %v1198_v24  ;;  %v698_v37 = vpack.c.bf16 %v696_v36, %v695_v35 }
  0x17   : > { %1155 = vmatprep.subr.bf16.mxu1 %v1199_v26 }
  0x19   : > { %1126 = vmatpush3.bf16.msra.mxu0 %v1190_v11 }
  0x1a   : > { %1131 = vmatprep.subr.bf16.mxu0 %v1191_v13  ;;  %1156 = vmatpush3.bf16.msra.mxu1 %v1199_v26 }
  0x1b   : > { %1157 = vmatprep.subr.bf16.mxu1 %v1200_v31 }
  0x1e   : > { %1158 = vmatpush3.bf16.msra.mxu1 %v1200_v31 }
  0x1f   : > { %1159 = vmatprep.subr.bf16.mxu1 %v1201_v38 }
  0x20   : > { %1128 = vmatmul.mubr.msk.bf16.vlgmr.msra.gmra.mrb[0].mxu0 %vm489_vm0, %v462_v21 }
  0x21   : > { %1132 = vmatpush3.bf16.msra.mxu0 %v1191_v13  ;;  %1135 = vmatprep.mubr.msk.bf16.mxu0 %vm489_vm0, %v616_v22 }
  0x22   : > { %1133 = vmatprep.subr.bf16.mxu0 %v1192_v23  ;;  %1160 = vmatpush3.bf16.msra.mxu1 %v1201_v38 }
  0x23   : > { %1161 = vmatprep.subr.bf16.mxu1 %v1202_v39 }
  0x25   : > { %1134 = vmatpush3.bf16.msra.mxu0 %v1192_v23 }
  0x26   : > { %1139 = vmatprep.subr.bf16.mxu0 %v1193_v25  ;;  %1162 = vmatpush3.bf16.msra.mxu1 %v1202_v39 }
  0x2c   : > { %1136 = vmatmul.mubr.msk.bf16.vlgmr.msra.gmra.mrb[0].mxu0 %vm489_vm0, %v617_v32 }
  0x2d   : > { %1140 = vmatpush3.bf16.msra.mxu0 %v1193_v25  ;;  %1143 = vmatprep.mubr.msk.bf16.mxu0 %vm489_vm0, %v697_v33 }
  0x2e   : > { %1141 = vmatprep.subr.bf16.mxu0 %v1194_v34 }
  0x31   : > { %1142 = vmatpush3.bf16.msra.mxu0 %v1194_v34 }
  0x38   : > { %1144 = vmatmul.mubr.msk.bf16.vlgmr.msra.gmra.mrb[0].mxu0 %vm489_vm0, %v698_v37 }
 0x10b   : > { %v1145_v41 = vpop.f32.mrb[0].mxu0 }
 0x10c   : > { %v783_v42 = vadd.f32 %v1145_v41, %v1058_v40  ;;  %v755_v43 = vpop.f32.mrb[1].mxu0 }
 0x10d   : > { %v781_v44 = vadd.f32 %v1058_v40, %v755_v43  ;;  %v1146_v45 = vpop.f32.mrb[2].mxu0 }
 0x10e   : > { %v784_v46 = vadd.f32 %v1146_v45, %v1058_v40  ;;  %v758_v47 = vpop.f32.mrb[3].mxu0  ;;  %v787_v49 = vmax.f32 %v783_v42, 0.0 }
 0x10f   : > { %v782_v48 = vadd.f32 %v1058_v40, %v758_v47  ;;  %v785_v51 = vmax.f32 %v781_v44, 0.0 }
 0x110   : > { %v788_v50 = vmax.f32 %v784_v46, 0.0 }
 0x111   : > { %v786_v52 = vmax.f32 %v782_v48, 0.0 }
 0x112   : > { %v790_v53 = vpack.c.bf16 %v788_v50, %v787_v49 }
 0x113   : > { %v789_v54 = vpack.c.bf16 %v786_v52, %v785_v51 }
 0x115   : > { %1163 = vmatprep.mubr.bf16.mxu1 %v789_v54 }
 0x116   : > { %1164 = vmatmul.mubr.bf16.vlgmr.msra.gmra.mrb[0].mxu1 %v790_v53 }
 0x1e9   : > { %v1165_v56 = vpop.f32.mrb[0].mxu1 }
 0x1ea   : > { %v905_v57 = vadd.f32 %v1165_v56, %v1059_v55  ;;  %v896_v58 = vpop.f32.mrb[1].mxu1 }
 0x1eb   : > { %v897_v59 = vadd.f32 %v1059_v55, %v896_v58  ;;  %v1166_v60 = vpop.f32.mrb[2].mxu1 }
 0x1ec   : > { %v908_v61 = vadd.f32 %v1166_v60, %v1059_v55  ;;  %v899_v62 = vpop.f32.mrb[3].mxu1  ;;  %v913_v0 = vmax.f32 %v905_v57, 0.0 }
 0x1ed   : > { %v900_v63 = vadd.f32 %v1059_v55, %v899_v62  ;;  %v911_v2 = vmax.f32 %v897_v59, 0.0 }
 0x1ee   : > { %v914_v1 = vmax.f32 %v908_v61, 0.0 }
 0x1ef   : > { %v912_v3 = vmax.f32 %v900_v63, 0.0 }
 0x1f0   : > { %v1086_v4 = vpack.c.bf16 %v914_v1, %v913_v0 }
 0x1f1   : > { %v1081_v5 = vpack.c.bf16 %v912_v3, %v911_v2 }
 0x1f2   : > { %1088 = vst [vmem:[%s454_s23 + $0x8] sm:$0xff] %v1086_v4  }
 0x1f3   : > { %1082 = vst [vmem:[%s454_s23] sm:$0xff] %v1081_v5  }
 0x1f4 PF: > { %s21_s17 = sadd.s32 1, %s1209_s17  }
 0x1f5   : > { %p18_p4 = scmp.ge.s32.totalorder %s21_s17, 4  }
 0x1f7   :  { %20 = sbr.rel (!%p18_p4) target bundleno = 1 (0x1), region = 103 }

</bundles_post_ra>
